<compile_context>
chip_gen: v6e
topology: v6e:2x2x1
jax: 0.10.0
libtpu: 0.0.40
codegen_flags: <defaults>
</compile_context>

<pallas_src>
import functools

import jax
import jax.numpy as jnp
from jax import lax
from jax.experimental import pallas as pl
from jax.experimental.pallas import tpu as pltpu


# ------------------------------ small helpers ---------------------------------

def _round_up(n, m):
    return ((n + m - 1) // m) * m


def _vmem_limit_bytes():
    """Chip-aware scoped-VMEM limit, leaving headroom under physical capacity."""
    cap = 64 * 1024 * 1024                      # conservative default (v7x physical VMEM)
    try:
        cap = int(pltpu.get_tpu_info().vmem_capacity_bytes)
    except Exception:
        pass
    return min(cap * 3 // 4, 100 * 1024 * 1024)  # 48 MiB on v7x, 96 MiB on v5e/v6e


_VMEM_LIMIT = _vmem_limit_bytes()
_TILE_BUDGET = int(_VMEM_LIMIT * 0.8)            # what the tile pickers may spend


def _divisors_multiple_of(n, m, cap):
    """Divisors of n that are multiples of m and <= cap, descending (n % m == 0)."""
    out = [d for d in range(m, min(n, cap) + 1, m) if n % d == 0]
    if not out:
        out = [n]
    return sorted(out, reverse=True)


def _pick_row_tile(m_rows, d, g, budget):
    """Row tile for the input projection, sized against the VMEM budget."""
    fixed = 2 * d * g * 2 + 2 * g * 4                 # weight (2 bufs, bf16) + bias (f32)
    per_row = 2 * d * 2 + 2 * g * 2                   # x + out blocks, double-buffered bf16
    for tm in _divisors_multiple_of(m_rows, 16, 2048):
        if fixed + tm * per_row <= budget:
            return tm
    return _divisors_multiple_of(m_rows, 16, 16)[-1]


def _pick_recurrence_tiles(t_total, b_pad, h_pad, g, last_only, budget):
    """(b_tile, t_chunk) for the recurrence, sized against the VMEM budget."""
    b_cands = _divisors_multiple_of(b_pad, 16, 256)
    if b_pad >= 32:
        # Prefer >= 2 batch tiles so both TensorCores work on v7x (cheap elsewhere).
        split = [b for b in b_cands if b <= b_pad // 2]
        b_cands = split or b_cands
    out_bytes = 4 if last_only else 2
    for b_tile in b_cands:
        fixed = h_pad * g * 2                          # resident W_hh^T (bf16, single buffer)
        fixed += 2 * b_tile * h_pad * 4                # h / c scratch (f32)
        if last_only:
            fixed += 2 * b_tile * h_pad * out_bytes    # (1, b_tile, H) resident out block
            per_t_out = 0
        else:
            per_t_out = 2 * b_tile * h_pad * out_bytes
        per_t = 2 * b_tile * g * 2 + per_t_out         # gx (bf16) + out, double-buffered
        best = 0
        for t in range(1, t_total + 1):
            if t_total % t == 0 and fixed + t * per_t <= budget:
                best = t
        if best:
            return b_tile, best
    return b_cands[-1], 1


# --------------------- kernel 1: hoisted input projection ---------------------

def _input_proj_kernel(x_ref, w_ref, b_ref, o_ref):
    # (tm, D) x (D, 4H_pad): bf16 operands, f32 accumulation, bf16 store.
    acc = jnp.dot(x_ref[...], w_ref[...], preferred_element_type=jnp.float32)
    o_ref[...] = (acc + b_ref[...]).astype(o_ref.dtype)


def input_projection(x_2d, wih_bf16, bias_f32):
    """x_2d: (M, D) bf16, wih: (D, 4H_pad) bf16, bias: (1, 4H_pad) f32 -> (M, 4H_pad) bf16."""
    M, D = x_2d.shape
    G = wih_bf16.shape[1]
    tm = _pick_row_tile(M, D, G, _TILE_BUDGET)
    # TODO(synk): for very large D*4H_pad on v7x, hold the weight single-buffered via
    # memory_space=pl.ANY + VMEM scratch instead of a constant-index (double-buffered) BlockSpec.
    return pl.pallas_call(
        _input_proj_kernel,
        out_shape=jax.ShapeDtypeStruct((M, G), jnp.bfloat16),
        grid_spec=pltpu.PrefetchScalarGridSpec(
            num_scalar_prefetch=0,
            grid=(M // tm,),
            in_specs=[
                pl.BlockSpec((tm, D), lambda i: (i, 0)),
                pl.BlockSpec((D, G), lambda i: (0, 0)),   # constant block index
                pl.BlockSpec((1, G), lambda i: (0, 0)),
            ],
            out_specs=pl.BlockSpec((tm, G), lambda i: (i, 0)),
        ),
        compiler_params=pltpu.CompilerParams(
            dimension_semantics=("parallel",),
            vmem_limit_bytes=_VMEM_LIMIT),
    )(x_2d, wih_bf16, bias_f32)


# ----------------------- kernel 2: LSTM recurrence -----------------------------

def _lstm_recurrence_kernel(gx_ref, whh_hbm, out_ref, h_sc, c_sc, whh_sc, dma_sem,
                            *, hidden_pad, t_chunk, last_only):
    ct = pl.program_id(1)   # time-chunk index (innermost, sequential)
    H = hidden_pad

    @pl.when(ct == 0)
    def _():
        # Resident recurrent weight, single-buffered; zero-init of h/c overlaps the DMA.
        cp = pltpu.make_async_copy(whh_hbm, whh_sc, dma_sem.at[0])
        cp.start()
        h_sc[...] = jnp.zeros_like(h_sc)
        c_sc[...] = jnp.zeros_like(c_sc)
        cp.wait()

    def step(i, carry):
        h, c = carry
        gates = gx_ref[i].astype(jnp.float32) + jnp.dot(
            h.astype(jnp.bfloat16), whh_sc[...],
            preferred_element_type=jnp.float32)
        # Gate layout [i, f, o, g]: one sigmoid slab + one tanh slab (lane-aligned slices).
        sig = jax.nn.sigmoid(gates[:, 0:3 * H])
        g_g = jnp.tanh(gates[:, 3 * H:4 * H])
        i_g = sig[:, 0 * H:1 * H]
        f_g = sig[:, 1 * H:2 * H]
        o_g = sig[:, 2 * H:3 * H]
        c = f_g * c + i_g * g_g
        h = o_g * jnp.tanh(c)
        if not last_only:
            out_ref[i] = h.astype(out_ref.dtype)
        return h, c

    h, c = lax.fori_loop(0, t_chunk, step, (h_sc[...], c_sc[...]),
                         unroll=(t_chunk <= 8))
    h_sc[...] = h
    c_sc[...] = c

    if last_only:
        @pl.when(ct == pl.num_programs(1) - 1)
        def _():
            out_ref[0] = h.astype(out_ref.dtype)


def lstm_recurrence(gates_x, whh_bf16, *, last_only):
    """gates_x: (T, B_pad, 4H_pad) bf16, whh: (H_pad, 4H_pad) bf16.

    Returns all hidden states (T, B_pad, H_pad) bf16, or just the final timestep
    (1, B_pad, H_pad) f32 when last_only.
    """
    T, B_pad, G = gates_x.shape
    H_pad = whh_bf16.shape[0]
    b_tile, t_chunk = _pick_recurrence_tiles(T, B_pad, H_pad, G, last_only, _TILE_BUDGET)
    n_b = B_pad // b_tile
    n_t = T // t_chunk

    if last_only:
        out_shape = jax.ShapeDtypeStruct((1, B_pad, H_pad), jnp.float32)
        out_spec = pl.BlockSpec((1, b_tile, H_pad), lambda cb, ct: (0, cb, 0))
    else:
        out_shape = jax.ShapeDtypeStruct((T, B_pad, H_pad), jnp.bfloat16)
        out_spec = pl.BlockSpec((t_chunk, b_tile, H_pad), lambda cb, ct: (ct, cb, 0))

    kernel = functools.partial(_lstm_recurrence_kernel,
                               hidden_pad=H_pad, t_chunk=t_chunk,
                               last_only=last_only)
    return pl.pallas_call(
        kernel,
        out_shape=out_shape,
        grid_spec=pltpu.PrefetchScalarGridSpec(
            num_scalar_prefetch=0,
            grid=(n_b, n_t),
            in_specs=[
                pl.BlockSpec((t_chunk, b_tile, G), lambda cb, ct: (ct, cb, 0)),
                pl.BlockSpec(memory_space=pl.ANY),      # W_hh^T stays in HBM
            ],
            out_specs=out_spec,
            scratch_shapes=[
                pltpu.VMEM((b_tile, H_pad), jnp.float32),   # h state
                pltpu.VMEM((b_tile, H_pad), jnp.float32),   # c state
                pltpu.VMEM((H_pad, G), jnp.bfloat16),       # resident W_hh^T (single buffer)
                pltpu.SemaphoreType.DMA((1,)),
            ],
        ),
        compiler_params=pltpu.CompilerParams(
            dimension_semantics=("parallel", "arbitrary"),
            vmem_limit_bytes=_VMEM_LIMIT),
    )(gates_x, whh_bf16)


# ------------------------- parameter preparation (once) ------------------------

_GATE_ORDER = (0, 1, 3, 2)   # repack PyTorch [i, f, g, o] as [i, f, o, g]


def prepare_params(params, in_dim, hidden_dim):
    """Transpose / pad / cast the PyTorch-layout parameters once.

    Per layer produces:
      wih^T : (D_pad, 4*H_pad) bf16   (gate order [i, f, o, g], each gate padded)
      whh^T : (H_pad, 4*H_pad) bf16
      bias  : (1, 4*H_pad) f32        (b_ih + b_hh, zero in padded gate columns)
    Padded hidden units see zero weights/bias => their h stays exactly 0.
    """
    H = hidden_dim
    H_pad = _round_up(H, 128)
    G = 4 * H_pad
    layers = []
    for li, (w_ih, w_hh, b_ih, b_hh) in enumerate(params["lstm"]):
        d = w_ih.shape[1]
        d_pad = _round_up(d, 8) if li == 0 else H_pad
        wih = jnp.zeros((d_pad, G), jnp.float32)
        whh = jnp.zeros((H_pad, G), jnp.float32)
        bias = jnp.zeros((1, G), jnp.float32)
        bsum = b_ih + b_hh
        for k, src in enumerate(_GATE_ORDER):
            wih = wih.at[:d, k * H_pad:k * H_pad + H].set(w_ih[src * H:(src + 1) * H, :].T)
            whh = whh.at[:H, k * H_pad:k * H_pad + H].set(w_hh[src * H:(src + 1) * H, :].T)
            bias = bias.at[0, k * H_pad:k * H_pad + H].set(bsum[src * H:(src + 1) * H])
        layers.append((wih.astype(jnp.bfloat16), whh.astype(jnp.bfloat16), bias))
    return {"layers": layers, "fc_w": params["fc_w"], "fc_b": params["fc_b"],
            "hidden": H, "hidden_pad": H_pad, "in_dim": in_dim}


# ------------------------------- RNN forward -----------------------------------

def rnn_forward(x_btd, prepared):
    """Matches RNN.forward: lstm(x) -> last timestep -> fc -> squeeze()."""
    B, T, D = x_btd.shape
    H = prepared["hidden"]
    n_layers = len(prepared["layers"])

    B_pad = _round_up(B, 16)
    d_pad0 = prepared["layers"][0][0].shape[0]
    x = jnp.transpose(x_btd, (1, 0, 2)).astype(jnp.bfloat16)       # (T, B, D) bf16
    x = jnp.pad(x, ((0, 0), (0, B_pad - B), (0, d_pad0 - D)))      # (T, B_pad, D_pad)

    for li, (wih, whh, bias) in enumerate(prepared["layers"]):
        last = li == n_layers - 1
        d_l = wih.shape[0]
        g = wih.shape[1]
        # Hoisted input projection: one big parallel matmul for the whole sequence.
        gx = input_projection(x.reshape(T * B_pad, d_l), wih, bias)
        gx = gx.reshape(T, B_pad, g)
        # Sequential recurrence; last layer only writes the final timestep.
        x = lstm_recurrence(gx, whh, last_only=last)

    h_last = x[0, :B, :H].astype(jnp.float32)                      # (B, H)
    # Final Linear(hidden, 1): lane-width-1 output -> left to XLA.
    out = h_last @ prepared["fc_w"].T + prepared["fc_b"]           # (B, 1)
    return jnp.squeeze(out)                                        # (B,)


# ------------------------- deterministic parameter init ------------------------

def init_params(key, in_dim, hidden_dim, n_layer):
    k = 1.0 / jnp.sqrt(jnp.float32(hidden_dim))
    params = {"lstm": []}
    for layer in range(n_layer):
        d = in_dim if layer == 0 else hidden_dim
        key, k1, k2, k3, k4 = jax.random.split(key, 5)
        w_ih = jax.random.uniform(k1, (4 * hidden_dim, d), jnp.float32, -k, k)
        w_hh = jax.random.uniform(k2, (4 * hidden_dim, hidden_dim), jnp.float32, -k, k)
        b_ih = jax.random.uniform(k3, (4 * hidden_dim,), jnp.float32, -k, k)
        b_hh = jax.random.uniform(k4, (4 * hidden_dim,), jnp.float32, -k, k)
        params["lstm"].append((w_ih, w_hh, b_ih, b_hh))
    key, k5, k6 = jax.random.split(key, 3)
    params["fc_w"] = jax.random.uniform(k5, (1, hidden_dim), jnp.float32, -k, k)
    params["fc_b"] = jax.random.uniform(k6, (1,), jnp.float32, -k, k)
    return params


# ------------------------------ pure-JAX reference ------------------------------

def ref_forward(x_btd, params):
    x = x_btd.astype(jnp.float32)
    B = x.shape[0]
    for (w_ih, w_hh, b_ih, b_hh) in params["lstm"]:
        H = w_hh.shape[1]
        h = jnp.zeros((B, H), jnp.float32)
        c = jnp.zeros((B, H), jnp.float32)
        outs = []
        for t in range(x.shape[1]):
            gates = x[:, t] @ w_ih.T + h @ w_hh.T + b_ih + b_hh
            i = jax.nn.sigmoid(gates[:, 0 * H:1 * H])
            f = jax.nn.sigmoid(gates[:, 1 * H:2 * H])
            g = jnp.tanh(gates[:, 2 * H:3 * H])
            o = jax.nn.sigmoid(gates[:, 3 * H:4 * H])
            c = f * c + i * g
            h = o * jnp.tanh(c)
            outs.append(h)
        x = jnp.stack(outs, axis=1)
    last = x[:, -1, :]
    out = last @ params["fc_w"].T + params["fc_b"]
    return jnp.squeeze(out)


if __name__ == "__main__":
    B, T, D, H, L = 4, 8, 16, 32, 2

    key = jax.random.PRNGKey(0)
    key, pkey, xkey = jax.random.split(key, 3)
    params = init_params(pkey, in_dim=D, hidden_dim=H, n_layer=L)
    prepared = prepare_params(params, in_dim=D, hidden_dim=H)
    x = jax.random.normal(xkey, (B, T, D), jnp.float32)   # batch_first like PyTorch

    out = rnn_forward(x, prepared)
    out = jax.block_until_ready(out)

    ref = ref_forward(x, params)
    assert out.shape == ref.shape == (B,)
    # bf16 matmul operands + bf16 gx / inter-layer h (f32 accumulation & gate math)
    # => loosened tolerance vs the pure-f32 reference.
    assert jnp.allclose(out, ref, atol=5e-2, rtol=5e-2), (out, ref)

    print("KERNEL_OK")
</pallas_src>

<mosaic_0001>
module attributes {stable_mosaic.version = 11 : i64} {
  func.func @_input_proj_kernel(%arg0: i32, %arg1: memref<128x16xbf16, #tpu.memory_space<vmem>>, %arg2: memref<16x512xbf16, #tpu.memory_space<vmem>>, %arg3: memref<1x512xf32, #tpu.memory_space<vmem>>, %arg4: memref<128x512xbf16, #tpu.memory_space<vmem>>) attributes {dimension_semantics = [#tpu.dimension_semantics<parallel>], iteration_bounds = array<i64: 1>, scalar_prefetch = 0 : i64, scratch_operands = 0 : i64, tpu.core_type = #tpu.core_type<tc>, window_params = [{transform_indices = @transform_0, window_bounds = array<i64: 128, 16>}, {pipeline_mode = #tpu.pipeline_mode<synchronous>, transform_indices = @transform_1, window_bounds = array<i64: 16, 512>}, {pipeline_mode = #tpu.pipeline_mode<synchronous>, transform_indices = @transform_2, window_bounds = array<i64: 1, 512>}, {transform_indices = @transform_3, window_bounds = array<i64: 128, 512>}]} {
    %c0 = arith.constant 0 : index
    %c0_0 = arith.constant 0 : index
    %0 = vector.load %arg1[%c0, %c0_0] : memref<128x16xbf16, #tpu.memory_space<vmem>>, vector<128x16xbf16>
    %c0_1 = arith.constant 0 : index
    %c0_2 = arith.constant 0 : index
    %1 = vector.load %arg2[%c0_1, %c0_2] : memref<16x512xbf16, #tpu.memory_space<vmem>>, vector<16x512xbf16>
    %cst = arith.constant dense<0.000000e+00> : vector<128x512xf32>
    %2 = tpu.matmul %0, %1, %cst {dimension_numbers = #tpu.dot_dimension_numbers<[1], [0], [0], [1], [0, 0, 1, 1], [], []>} : vector<128x16xbf16>, vector<16x512xbf16>, vector<128x512xf32> -> vector<128x512xf32>
    %c0_3 = arith.constant 0 : index
    %c0_4 = arith.constant 0 : index
    %3 = vector.load %arg3[%c0_3, %c0_4] : memref<1x512xf32, #tpu.memory_space<vmem>>, vector<1x512xf32>
    %4 = vector.broadcast %3 : vector<1x512xf32> to vector<128x512xf32>
    %5 = arith.addf %2, %4 : vector<128x512xf32>
    %6 = arith.truncf %5 : vector<128x512xf32> to vector<128x512xbf16>
    %c0_5 = arith.constant 0 : index
    %c0_6 = arith.constant 0 : index
    %7 = vector.load %arg4[%c0_5, %c0_6] : memref<128x512xbf16, #tpu.memory_space<vmem>>, vector<128x512xbf16>
    tpu.vector_store %arg4[%c0_5, %c0_6], %6 {strides = array<i32>} : memref<128x512xbf16, #tpu.memory_space<vmem>>, vector<128x512xbf16>,
    return
  }
  func.func @transform_0(%arg0: i32) -> (i32, i32) {
    %c0_i32 = arith.constant 0 : i32
    %c0_i32_0 = arith.constant 0 : i32
    return %arg0, %c0_i32 : i32, i32
  }
  func.func @transform_1(%arg0: i32) -> (i32, i32) {
    %c0_i32 = arith.constant 0 : i32
    %c0_i32_0 = arith.constant 0 : i32
    %c0_i32_1 = arith.constant 0 : i32
    return %c0_i32, %c0_i32_0 : i32, i32
  }
  func.func @transform_2(%arg0: i32) -> (i32, i32) {
    %c0_i32 = arith.constant 0 : i32
    %c0_i32_0 = arith.constant 0 : i32
    %c0_i32_1 = arith.constant 0 : i32
    return %c0_i32, %c0_i32_0 : i32, i32
  }
  func.func @transform_3(%arg0: i32) -> (i32, i32) {
    %c0_i32 = arith.constant 0 : i32
    %c0_i32_0 = arith.constant 0 : i32
    return %arg0, %c0_i32 : i32, i32
  }
}

</mosaic_0001>

<bundles_post_ra>
// kernel: tpu_custom_call.1
= control target key start
LH: loop header
LB: loop body
LE: loop exit
PB: predicated region body
PF: predicated region fallthrough
CT: control target
= control target key end

     0   :  { %v741_v2 = vmov 0   ;;  %vm118_vm0 = vcmask 130048   ;;  %s895_s0 = inlined_call_operand.vmem [shape: bf16[128,16], index: 0, kind: input, shape index: {}]   ;;  %s896_s1 = inlined_call_operand.vmem [shape: bf16[16,512], index: 1, kind: input, shape index: {}]   ;;  %s897_s2 = inlined_call_operand.vmem [shape: f32[1,512], index: 2, kind: input, shape index: {}]   ;;  %s898_s3 = inlined_call_operand.hbm [shape: bf16[128,512], index: 3, kind: output, shape index: {}]  }
   0x1   :  { %v705_v0 = vld [vmem:[%s896_s1 + $0x4] ss:$16 sps:$4 sm:$0xff]   ;;  %v707_v1 = vld [vmem:[%s896_s1 + $0xc] ss:$16 sps:$4 sm:$0xff]   ;;  %175 = vmatprep.mubr.bf16.mxu0 %v741_v2  ;;  %288 = vmatprep.mubr.bf16.mxu1 %v741_v2  ;;  %v709_v3 = vld [vmem:[%s896_s1] ss:$16 sps:$4 sm:$0xff]  }
   0x2   :  { %157 = vmatprep.subr.bf16.mxu0 %v705_v0  ;;  %v710_v4 = vld [vmem:[%s896_s1 + $0x8] ss:$16 sps:$4 sm:$0xff]   ;;  %270 = vmatprep.subr.bf16.mxu1 %v707_v1  ;;  %v711_v5 = vld [vmem:[%s895_s0] sm:$0xff]  }
   0x3   :  { %158 = vmatpush1.bf16.msra.mxu0 %v709_v3  ;;  %271 = vmatpush1.bf16.msra.mxu1 %v710_v4  ;;  %v712_v6 = vld [vmem:[%s895_s0 + $0x8] sm:$0xff]  }
   0x6   :  { %621 = vmatmul.mubr.msk.bf16.vlgmr.msra.gmra.mxu0 %vm118_vm0, %v711_v5  ;;  %629 = vmatmul.mubr.msk.bf16.vlgmr.msra.gmra.mxu1 %vm118_vm0, %v711_v5 }
   0x7   :  { %185 = vmatprep.mubr.bf16.mxu0 %v741_v2  ;;  %298 = vmatprep.mubr.bf16.mxu1 %v741_v2 }
   0x8   :  { %8 = vsyncpa [#allocation3], 0  ;;  %v713_v7 = vld [vmem:[%s895_s0 + $0x10] sm:$0xff]   ;;  %v714_v8 = vld [vmem:[%s895_s0 + $0x18] sm:$0xff]   ;;  %v38_v13 = vlaneseq }
   0x9   :  { %v715_v9 = vld [vmem:[%s895_s0 + $0x20] sm:$0xff]   ;;  %v716_v10 = vld [vmem:[%s895_s0 + $0x28] sm:$0xff]   ;;  %v717_v11 = vld [vmem:[%s895_s0 + $0x30] sm:$0xff]  }
   0xa   :  { %v718_v12 = vld [vmem:[%s895_s0 + $0x38] sm:$0xff]   ;;  %v39_v14 = vshrl.u32 %v38_v13, 7  ;;  %v36_v19 = vld [vmem:[%s897_s2] sm:$0xf]  ;;  %s742_s0 = smov [#allocation2]  }
   0xb   :  { %s598_s2 = sshll.u32 %s742_s0, 4  ;;  %s599_s2 = int_to_ptr.vmem [resolvable:$true] %s598_s2 }
   0xc   :  { %v40_v15 = vsub.s32 0, %v39_v14  ;;  %v48_v16 = vsub.s32 2, %v39_v14  ;;  %v44_v17 = vsub.s32 1, %v39_v14  ;;  %v52_v18 = vsub.s32 3, %v39_v14  ;;  %s719_s10 = scalar_lea.vmem %s599_s2, 4096  ;;  %p724_p1 = scmp.lt.s32.totalorder %s599_s2, %s599_s2 }
   0xd   :  { %p720_p0 = scmp.ne.s32.totalorder %s599_s2, %s719_s10  ;;  %p725_p2 = scmp.lt.s32.totalorder %s719_s10, %s719_s10 }
   0xe   :  { %622 = vmatmul.mubr.msk.bf16.gmra.mxu0 %vm118_vm0, %v712_v6  ;;  %630 = vmatmul.mubr.msk.bf16.gmra.mxu1 %vm118_vm0, %v712_v6  ;;  %v820_v20 = vrot.slane %v36_v19, %v40_v15  ;;  %v822_v21 = vrot.slane %v36_v19, %v48_v16  ;;  %v824_v22 = vrot.slane %v36_v19, %v44_v17 }
   0xf   :  { %195 = vmatprep.mubr.bf16.mxu0 %v741_v2  ;;  %308 = vmatprep.mubr.bf16.mxu1 %v741_v2  ;;  %v826_v23 = vrot.slane %v36_v19, %v52_v18  ;;  %p726_p3 = por %p725_p2, %p724_p1 }
  0x11   :  { %p727_p4 = pnand %p726_p3, %p720_p0 }
  0x16   :  { %623 = vmatmul.mubr.msk.bf16.gmra.mxu0 %vm118_vm0, %v713_v7  ;;  %631 = vmatmul.mubr.msk.bf16.gmra.mxu1 %vm118_vm0, %v713_v7 }
  0x17   :  { %205 = vmatprep.mubr.bf16.mxu0 %v741_v2  ;;  %318 = vmatprep.mubr.bf16.mxu1 %v741_v2 }
  0x1e   :  { %624 = vmatmul.mubr.msk.bf16.gmra.mxu0 %vm118_vm0, %v714_v8  ;;  %632 = vmatmul.mubr.msk.bf16.gmra.mxu1 %vm118_vm0, %v714_v8 }
  0x1f   :  { %215 = vmatprep.mubr.bf16.mxu0 %v741_v2  ;;  %328 = vmatprep.mubr.bf16.mxu1 %v741_v2 }
  0x26   :  { %625 = vmatmul.mubr.msk.bf16.gmra.mxu0 %vm118_vm0, %v715_v9  ;;  %633 = vmatmul.mubr.msk.bf16.gmra.mxu1 %vm118_vm0, %v715_v9 }
  0x27   :  { %225 = vmatprep.mubr.bf16.mxu0 %v741_v2  ;;  %338 = vmatprep.mubr.bf16.mxu1 %v741_v2 }
  0x2e   :  { %626 = vmatmul.mubr.msk.bf16.gmra.mxu0 %vm118_vm0, %v716_v10  ;;  %634 = vmatmul.mubr.msk.bf16.gmra.mxu1 %vm118_vm0, %v716_v10 }
  0x2f   :  { %235 = vmatprep.mubr.bf16.mxu0 %v741_v2  ;;  %348 = vmatprep.mubr.bf16.mxu1 %v741_v2 }
  0x36   :  { %627 = vmatmul.mubr.msk.bf16.gmra.mxu0 %vm118_vm0, %v717_v11  ;;  %635 = vmatmul.mubr.msk.bf16.gmra.mxu1 %vm118_vm0, %v717_v11 }
  0x37   :  { %245 = vmatprep.mubr.bf16.mxu0 %v741_v2  ;;  %358 = vmatprep.mubr.bf16.mxu1 %v741_v2 }
  0x3e   :  { %628 = vmatmul.mubr.msk.bf16.gmra.mxu0 %vm118_vm0, %v718_v12  ;;  %636 = vmatmul.mubr.msk.bf16.gmra.mxu1 %vm118_vm0, %v718_v12 }
  0xc6   :  { %v177_v24 = vpop.f32.mrf.mxu0  ;;  %v290_v25 = vpop.f32.mrf.mxu1 }
  0xc7   :  { %v178_v28 = vadd.f32 %v177_v24, %v820_v20  ;;  %v291_v29 = vadd.f32 %v290_v25, %v822_v21 }
  0xc8   :  { %v179_v26 = vpop.f32.mrf.mxu0  ;;  %v292_v27 = vpop.f32.mrf.mxu1 }
  0xc9   :  { %v180_v30 = vadd.f32 %v179_v26, %v824_v22  ;;  %v293_v31 = vadd.f32 %v292_v27, %v826_v23 }
  0xca   :  { %v181_v32 = vpop.f32.mrf.mxu0  ;;  %v294_v33 = vpop.f32.mrf.mxu1 }
  0xcb   :  { %v669_v34 = vpack.c.bf16 %v180_v30, %v178_v28  ;;  %v670_v35 = vpack.c.bf16 %v293_v31, %v291_v29  ;;  %v182_v38 = vadd.f32 %v181_v32, %v820_v20  ;;  %v295_v39 = vadd.f32 %v294_v33, %v822_v21 }
  0xcc   :  { %v183_v36 = vpop.f32.mrf.mxu0  ;;  %v296_v37 = vpop.f32.mrf.mxu1 }
  0xcd   :  { %561 = vst [vmem:[#allocation2] sm:$0xff] %v669_v34  ;;  %562 = vst [vmem:[#allocation2 + $0x8] sm:$0xff] %v670_v35  ;;  %v184_v40 = vadd.f32 %v183_v36, %v824_v22  ;;  %v297_v41 = vadd.f32 %v296_v37, %v826_v23 }
  0xce   :  { %v187_v42 = vpop.f32.mrf.mxu0  ;;  %v300_v43 = vpop.f32.mrf.mxu1 }
  0xcf   :  { %v671_v44 = vpack.c.bf16 %v184_v40, %v182_v38  ;;  %v672_v45 = vpack.c.bf16 %v297_v41, %v295_v39  ;;  %v188_v48 = vadd.f32 %v187_v42, %v820_v20  ;;  %v301_v49 = vadd.f32 %v300_v43, %v822_v21 }
  0xd0   :  { %v189_v46 = vpop.f32.mrf.mxu0  ;;  %v302_v47 = vpop.f32.mrf.mxu1 }
  0xd1   :  { %563 = vst [vmem:[#allocation2 + $0x10] sm:$0xff] %v671_v44  ;;  %564 = vst [vmem:[#allocation2 + $0x18] sm:$0xff] %v672_v45  ;;  %v190_v50 = vadd.f32 %v189_v46, %v824_v22  ;;  %v303_v51 = vadd.f32 %v302_v47, %v826_v23 }
  0xd2   :  { %v191_v52 = vpop.f32.mrf.mxu0  ;;  %v304_v53 = vpop.f32.mrf.mxu1 }
  0xd3   :  { %v673_v54 = vpack.c.bf16 %v190_v50, %v188_v48  ;;  %v674_v55 = vpack.c.bf16 %v303_v51, %v301_v49  ;;  %v192_v58 = vadd.f32 %v191_v52, %v820_v20  ;;  %v305_v59 = vadd.f32 %v304_v53, %v822_v21 }
  0xd4   :  { %v193_v56 = vpop.f32.mrf.mxu0  ;;  %v306_v57 = vpop.f32.mrf.mxu1 }
  0xd5   :  { %565 = vst [vmem:[#allocation2 + $0x20] sm:$0xff] %v673_v54  ;;  %566 = vst [vmem:[#allocation2 + $0x28] sm:$0xff] %v674_v55  ;;  %v194_v60 = vadd.f32 %v193_v56, %v824_v22  ;;  %v307_v61 = vadd.f32 %v306_v57, %v826_v23 }
  0xd6   :  { %v197_v62 = vpop.f32.mrf.mxu0  ;;  %v310_v63 = vpop.f32.mrf.mxu1 }
  0xd7   :  { %v675_v0 = vpack.c.bf16 %v194_v60, %v192_v58  ;;  %v676_v1 = vpack.c.bf16 %v307_v61, %v305_v59  ;;  %v198_v4 = vadd.f32 %v197_v62, %v820_v20  ;;  %v311_v5 = vadd.f32 %v310_v63, %v822_v21 }
  0xd8   :  { %v199_v2 = vpop.f32.mrf.mxu0  ;;  %v312_v3 = vpop.f32.mrf.mxu1 }
  0xd9   :  { %567 = vst [vmem:[#allocation2 + $0x30] sm:$0xff] %v675_v0  ;;  %568 = vst [vmem:[#allocation2 + $0x38] sm:$0xff] %v676_v1  ;;  %v200_v6 = vadd.f32 %v199_v2, %v824_v22  ;;  %v313_v7 = vadd.f32 %v312_v3, %v826_v23 }
  0xda   :  { %v201_v8 = vpop.f32.mrf.mxu0  ;;  %v314_v9 = vpop.f32.mrf.mxu1 }
  0xdb   :  { %v677_v10 = vpack.c.bf16 %v200_v6, %v198_v4  ;;  %v678_v11 = vpack.c.bf16 %v313_v7, %v311_v5  ;;  %v202_v14 = vadd.f32 %v201_v8, %v820_v20  ;;  %v315_v15 = vadd.f32 %v314_v9, %v822_v21 }
  0xdc   :  { %v203_v12 = vpop.f32.mrf.mxu0  ;;  %v316_v13 = vpop.f32.mrf.mxu1 }
  0xdd   :  { %569 = vst [vmem:[#allocation2 + $0x40] sm:$0xff] %v677_v10  ;;  %570 = vst [vmem:[#allocation2 + $0x48] sm:$0xff] %v678_v11  ;;  %v204_v16 = vadd.f32 %v203_v12, %v824_v22  ;;  %v317_v17 = vadd.f32 %v316_v13, %v826_v23 }
  0xde   :  { %v207_v18 = vpop.f32.mrf.mxu0  ;;  %v320_v19 = vpop.f32.mrf.mxu1 }
  0xdf   :  { %v679_v24 = vpack.c.bf16 %v204_v16, %v202_v14  ;;  %v680_v25 = vpack.c.bf16 %v317_v17, %v315_v15  ;;  %v208_v28 = vadd.f32 %v207_v18, %v820_v20  ;;  %v321_v29 = vadd.f32 %v320_v19, %v822_v21 }
  0xe0   :  { %v209_v26 = vpop.f32.mrf.mxu0  ;;  %v322_v27 = vpop.f32.mrf.mxu1 }
  0xe1   :  { %571 = vst [vmem:[#allocation2 + $0x50] sm:$0xff] %v679_v24  ;;  %572 = vst [vmem:[#allocation2 + $0x58] sm:$0xff] %v680_v25  ;;  %v210_v30 = vadd.f32 %v209_v26, %v824_v22  ;;  %v323_v31 = vadd.f32 %v322_v27, %v826_v23 }
  0xe2   :  { %v211_v32 = vpop.f32.mrf.mxu0  ;;  %v324_v33 = vpop.f32.mrf.mxu1 }
  0xe3   :  { %v681_v34 = vpack.c.bf16 %v210_v30, %v208_v28  ;;  %v682_v35 = vpack.c.bf16 %v323_v31, %v321_v29  ;;  %v212_v38 = vadd.f32 %v211_v32, %v820_v20  ;;  %v325_v39 = vadd.f32 %v324_v33, %v822_v21 }
  0xe4   :  { %v213_v36 = vpop.f32.mrf.mxu0  ;;  %v326_v37 = vpop.f32.mrf.mxu1 }
  0xe5   :  { %573 = vst [vmem:[#allocation2 + $0x60] sm:$0xff] %v681_v34  ;;  %574 = vst [vmem:[#allocation2 + $0x68] sm:$0xff] %v682_v35  ;;  %v214_v40 = vadd.f32 %v213_v36, %v824_v22  ;;  %v327_v41 = vadd.f32 %v326_v37, %v826_v23 }
  0xe6   :  { %v217_v42 = vpop.f32.mrf.mxu0  ;;  %v330_v43 = vpop.f32.mrf.mxu1 }
  0xe7   :  { %v683_v44 = vpack.c.bf16 %v214_v40, %v212_v38  ;;  %v684_v45 = vpack.c.bf16 %v327_v41, %v325_v39  ;;  %v218_v48 = vadd.f32 %v217_v42, %v820_v20  ;;  %v331_v49 = vadd.f32 %v330_v43, %v822_v21 }
  0xe8   :  { %v219_v46 = vpop.f32.mrf.mxu0  ;;  %v332_v47 = vpop.f32.mrf.mxu1 }
  0xe9   :  { %575 = vst [vmem:[#allocation2 + $0x70] sm:$0xff] %v683_v44  ;;  %576 = vst [vmem:[#allocation2 + $0x78] sm:$0xff] %v684_v45  ;;  %v220_v50 = vadd.f32 %v219_v46, %v824_v22  ;;  %v333_v51 = vadd.f32 %v332_v47, %v826_v23 }
  0xea   :  { %v221_v52 = vpop.f32.mrf.mxu0  ;;  %v334_v53 = vpop.f32.mrf.mxu1 }
  0xeb   :  { %v685_v54 = vpack.c.bf16 %v220_v50, %v218_v48  ;;  %v686_v55 = vpack.c.bf16 %v333_v51, %v331_v49  ;;  %v222_v58 = vadd.f32 %v221_v52, %v820_v20  ;;  %v335_v59 = vadd.f32 %v334_v53, %v822_v21 }
  0xec   :  { %v223_v56 = vpop.f32.mrf.mxu0  ;;  %v336_v57 = vpop.f32.mrf.mxu1 }
  0xed   :  { %577 = vst [vmem:[#allocation2 + $0x80] sm:$0xff] %v685_v54  ;;  %578 = vst [vmem:[#allocation2 + $0x88] sm:$0xff] %v686_v55  ;;  %v224_v60 = vadd.f32 %v223_v56, %v824_v22  ;;  %v337_v61 = vadd.f32 %v336_v57, %v826_v23 }
  0xee   :  { %v227_v62 = vpop.f32.mrf.mxu0  ;;  %v340_v63 = vpop.f32.mrf.mxu1 }
  0xef   :  { %v687_v0 = vpack.c.bf16 %v224_v60, %v222_v58  ;;  %v688_v1 = vpack.c.bf16 %v337_v61, %v335_v59  ;;  %v228_v4 = vadd.f32 %v227_v62, %v820_v20  ;;  %v341_v5 = vadd.f32 %v340_v63, %v822_v21 }
  0xf0   :  { %v229_v2 = vpop.f32.mrf.mxu0  ;;  %v342_v3 = vpop.f32.mrf.mxu1 }
  0xf1   :  { %579 = vst [vmem:[#allocation2 + $0x90] sm:$0xff] %v687_v0  ;;  %580 = vst [vmem:[#allocation2 + $0x98] sm:$0xff] %v688_v1  ;;  %v230_v6 = vadd.f32 %v229_v2, %v824_v22  ;;  %v343_v7 = vadd.f32 %v342_v3, %v826_v23 }
  0xf2   :  { %v231_v8 = vpop.f32.mrf.mxu0  ;;  %v344_v9 = vpop.f32.mrf.mxu1 }
  0xf3   :  { %v689_v10 = vpack.c.bf16 %v230_v6, %v228_v4  ;;  %v690_v11 = vpack.c.bf16 %v343_v7, %v341_v5  ;;  %v232_v14 = vadd.f32 %v231_v8, %v820_v20  ;;  %v345_v15 = vadd.f32 %v344_v9, %v822_v21 }
  0xf4   :  { %v233_v12 = vpop.f32.mrf.mxu0  ;;  %v346_v13 = vpop.f32.mrf.mxu1 }
  0xf5   :  { %581 = vst [vmem:[#allocation2 + $0xa0] sm:$0xff] %v689_v10  ;;  %582 = vst [vmem:[#allocation2 + $0xa8] sm:$0xff] %v690_v11  ;;  %v234_v16 = vadd.f32 %v233_v12, %v824_v22  ;;  %v347_v17 = vadd.f32 %v346_v13, %v826_v23 }
  0xf6   :  { %v237_v18 = vpop.f32.mrf.mxu0  ;;  %v350_v19 = vpop.f32.mrf.mxu1 }
  0xf7   :  { %v691_v24 = vpack.c.bf16 %v234_v16, %v232_v14  ;;  %v692_v25 = vpack.c.bf16 %v347_v17, %v345_v15  ;;  %v238_v28 = vadd.f32 %v237_v18, %v820_v20  ;;  %v351_v29 = vadd.f32 %v350_v19, %v822_v21 }
  0xf8   :  { %v239_v26 = vpop.f32.mrf.mxu0  ;;  %v352_v27 = vpop.f32.mrf.mxu1 }
  0xf9   :  { %583 = vst [vmem:[#allocation2 + $0xb0] sm:$0xff] %v691_v24  ;;  %584 = vst [vmem:[#allocation2 + $0xb8] sm:$0xff] %v692_v25  ;;  %v240_v30 = vadd.f32 %v239_v26, %v824_v22  ;;  %v353_v31 = vadd.f32 %v352_v27, %v826_v23 }
  0xfa   :  { %v241_v32 = vpop.f32.mrf.mxu0  ;;  %v354_v33 = vpop.f32.mrf.mxu1 }
  0xfb   :  { %v693_v34 = vpack.c.bf16 %v240_v30, %v238_v28  ;;  %v694_v35 = vpack.c.bf16 %v353_v31, %v351_v29  ;;  %v242_v38 = vadd.f32 %v241_v32, %v820_v20  ;;  %v355_v39 = vadd.f32 %v354_v33, %v822_v21 }
  0xfc   :  { %v243_v36 = vpop.f32.mrf.mxu0  ;;  %v356_v37 = vpop.f32.mrf.mxu1 }
  0xfd   :  { %585 = vst [vmem:[#allocation2 + $0xc0] sm:$0xff] %v693_v34  ;;  %586 = vst [vmem:[#allocation2 + $0xc8] sm:$0xff] %v694_v35  ;;  %v244_v40 = vadd.f32 %v243_v36, %v824_v22  ;;  %v357_v41 = vadd.f32 %v356_v37, %v826_v23 }
  0xfe   :  { %v247_v42 = vpop.f32.mrf.mxu0  ;;  %v360_v43 = vpop.f32.mrf.mxu1 }
  0xff   :  { %v695_v44 = vpack.c.bf16 %v244_v40, %v242_v38  ;;  %v696_v45 = vpack.c.bf16 %v357_v41, %v355_v39  ;;  %v248_v48 = vadd.f32 %v247_v42, %v820_v20  ;;  %v361_v49 = vadd.f32 %v360_v43, %v822_v21 }
 0x100   :  { %v249_v46 = vpop.f32.mrf.mxu0  ;;  %v362_v47 = vpop.f32.mrf.mxu1 }
 0x101   :  { %587 = vst [vmem:[#allocation2 + $0xd0] sm:$0xff] %v695_v44  ;;  %588 = vst [vmem:[#allocation2 + $0xd8] sm:$0xff] %v696_v45  ;;  %v250_v50 = vadd.f32 %v249_v46, %v824_v22  ;;  %v363_v51 = vadd.f32 %v362_v47, %v826_v23 }
 0x102   :  { %v251_v52 = vpop.f32.mrf.mxu0  ;;  %v364_v53 = vpop.f32.mrf.mxu1 }
 0x103   :  { %v697_v54 = vpack.c.bf16 %v250_v50, %v248_v48  ;;  %v698_v55 = vpack.c.bf16 %v363_v51, %v361_v49  ;;  %v252_v58 = vadd.f32 %v251_v52, %v820_v20  ;;  %v365_v59 = vadd.f32 %v364_v53, %v822_v21 }
 0x104   :  { %v253_v56 = vpop.f32.mrf.mxu0  ;;  %v366_v57 = vpop.f32.mrf.mxu1 }
 0x105   :  { %589 = vst [vmem:[#allocation2 + $0xe0] sm:$0xff] %v697_v54  ;;  %590 = vst [vmem:[#allocation2 + $0xe8] sm:$0xff] %v698_v55  ;;  %v254_v60 = vadd.f32 %v253_v56, %v824_v22  ;;  %v367_v61 = vadd.f32 %v366_v57, %v826_v23 }
 0x107   :  { %v699_v62 = vpack.c.bf16 %v254_v60, %v252_v58  ;;  %v700_v63 = vpack.c.bf16 %v367_v61, %v365_v59 }
 0x109   :  { %591 = vst [vmem:[#allocation2 + $0xf0] sm:$0xff] %v699_v62  ;;  %592 = vst [vmem:[#allocation2 + $0xf8] sm:$0xff] %v700_v63 }
 0x10a   :  { %730 = shalt.err (!%p727_p4)
}
 0x10b   :  { %s743_s11 = smov 256   ;;  %s744_s12 = smov 16  }
 0x10c   :  { %604 = dma.vmem_to_hbm [thread:$0]  %s599_s2, 4096, %s898_s3, [#allocation3], %s743_s11, %s743_s11, %s744_s12  }
 0x10d   :  { %739 = dma.done.wait [#allocation3], 4096  }
 0x10e   :  { %740 = vsyncadd [#allocation3], 4294963200 }
 0x10f   :  { %608 = vsyncpa [#allocation3], 1 }

</bundles_post_ra>
